<compile_context>
chip_gen: v5e
topology: v5e:2x2
jax: 0.10.0
libtpu: 0.0.40
codegen_flags: <defaults>
</compile_context>

<pallas_src>
import functools

import jax
import jax.numpy as jnp
from jax.experimental import pallas as pl
from jax.experimental.pallas import tpu as pltpu


def _round_up(x, m):
    return ((x + m - 1) // m) * m


def _cdiv(a, b):
    return (a + b - 1) // b


def _align_kernel(cyx_ref, pxy_ref, ex_ref, ey_ref, out_ref, a_scr, acc_scr,
                  *, tvy, vx, vy, ey_resident, mask_vx, mask_vy):
    # Block shapes:
    #   cyx_ref (1, Kp, Kp)        pxy_ref (1, TVx, TVy)
    #   ex_ref  (1, TVx, Kp)       ey_ref  (1, Vyp, Kp)  [resident]
    #                                      (1, TVy, Kp)  [tiled fallback]
    #   out_ref (1, 1, 8, 128)
    #   a_scr / acc_scr : (TVx, Kp) f32 VMEM scratch
    i = pl.program_id(1)
    j = pl.program_id(2)
    nj = pl.num_programs(2)

    @pl.when(j == 0)
    def _init():
        # Hoisted small matmul: once per (b, vx-tile), not once per Vy tile.
        a_scr[...] = jnp.dot(ex_ref[0], cyx_ref[0],
                             preferred_element_type=jnp.float32)
        acc_scr[...] = jnp.zeros_like(acc_scr)

    p = pxy_ref[0]
    if mask_vy:
        # Ragged Vy edge: zero out-of-range Pxy columns before the MXU.
        col = jax.lax.broadcasted_iota(jnp.int32, p.shape, 1)
        p = jnp.where(col < (vy - j * tvy), p, jnp.zeros_like(p))

    if ey_resident:
        start = pl.multiple_of(j * tvy, tvy)
        ey = ey_ref[0, pl.ds(start, tvy), :]
    else:
        ey = ey_ref[0]

    # Accumulate the Vy-tiled product Pxy_tile @ Ey_tile in f32.
    acc_scr[...] += jnp.dot(p, ey, preferred_element_type=jnp.float32)

    @pl.when(j == nj - 1)
    def _finish():
        d = a_scr[...] - acc_scr[...]
        if mask_vx:
            # Ragged Vx edge: drop out-of-range rows from the Frobenius sum.
            row = jax.lax.broadcasted_iota(jnp.int32, d.shape, 0)
            d = jnp.where(row < (vx - i * d.shape[0]), d, jnp.zeros_like(d))
        # Lane/sublane-dense scalar output: splat the partial Frobenius sum
        # into a full (8, 128) tile; the wrapper reads element [0, 0].
        out_ref[0, 0] = jnp.broadcast_to(jnp.sum(d * d), (8, 128))


def align_loss(Cyx, Pxy, evecs_x, evecs_y, loss_weight=1.0,
               tvx=512, tvy=2048, ey_resident_max_bytes=16 << 20):
    """Pallas TPU implementation of AlignLoss.forward.

    tvx / tvy: Vx / Vy tile sizes.  Defaults (512, 2048) give a 4 MiB f32 Pxy
        block that double-buffers inside v7x's 64 MiB VMEM; on v5e/v6e
        (128 MiB) tvy can be raised to 4096-8192 for slightly better roofline.
    ey_resident_max_bytes: budget for keeping the full per-batch evecs_y
        resident in VMEM (double-buffered); above it the kernel falls back to
        per-Vy-tile Ey fetches.
    """
    B, K, K2 = Cyx.shape
    assert K == K2
    B2, Vx, Vy = Pxy.shape
    assert B2 == B
    assert evecs_x.shape == (B, Vx, K)
    assert evecs_y.shape == (B, Vy, K)

    # The dominant Pxy stream is used exactly as given (no wrapper pad / cast
    # copies of it); the small operands are padded / cast to match its dtype.
    dt = Pxy.dtype
    bpe = jnp.dtype(dt).itemsize
    Kp = _round_up(K, 128)

    # ---- Vx tiling --------------------------------------------------------
    if Vx <= tvx:
        TVx = Vx                              # full-dim block (any size OK)
    else:
        TVx = max(8, (tvx // 8) * 8)          # sublane-aligned tile
    NVX = _cdiv(Vx, TVx)
    # v7x has 2 TensorCores: make sure the "parallel" axes carry >= 2 tiles.
    if B * NVX < 2 and Vx >= 16:
        TVx = _round_up(_cdiv(Vx, 2), 8)
        NVX = _cdiv(Vx, TVx)
    mask_vx = (Vx % TVx) != 0

    # ---- Vy tiling --------------------------------------------------------
    if Vy <= tvy:
        TVy = Vy                              # full-dim block (any size OK)
    else:
        TVy = max(128, (tvy // 128) * 128)    # lane-aligned tile
    NVY = _cdiv(Vy, TVy)
    mask_vy = (Vy % TVy) != 0
    Vyp = NVY * TVy                           # Ey rows padded with zeros

    # Per-batch VMEM-resident Ey (one HBM fetch per batch) unless too big.
    ey_resident = (2 * Vyp * Kp * bpe) <= ey_resident_max_bytes

    def pad_cast(x, shape):
        pads = [(0, t - s) for s, t in zip(x.shape, shape)]
        if any(hi for _, hi in pads):
            x = jnp.pad(x, pads)              # zero pad -> adds 0 to the loss
        return x.astype(dt)

    Cyx_p = pad_cast(Cyx, (B, Kp, Kp))
    Ex_p = pad_cast(evecs_x, (B, Vx, Kp))
    Ey_p = pad_cast(evecs_y, (B, Vyp, Kp))

    # ---- VMEM budget: actual need + margin (no artificial floor / clamp) --
    ey_buf = Vyp * Kp if ey_resident else TVy * Kp
    need = (2 * bpe * Kp * Kp              # Cyx  (double-buffered)
            + 2 * bpe * TVx * TVy          # Pxy
            + 2 * bpe * TVx * Kp           # Ex
            + 2 * bpe * ey_buf             # Ey
            + 2 * 4 * TVx * Kp             # f32 scratch (A, acc)
            + 2 * 4 * 8 * 128)             # output tile
    vmem_bytes = int(need * 1.25) + (8 << 20)

    # ---- Cost estimate (real traffic, incl. Ey residency factor) ----------
    ey_reads = B if ey_resident else B * NVX
    cost = pl.CostEstimate(
        flops=2 * B * NVX * TVx * (NVY * TVy * Kp + Kp * Kp) + 3 * B * Vx * Kp,
        transcendentals=0,
        bytes_accessed=(Cyx_p.size * bpe
                        + Pxy.size * jnp.dtype(Pxy.dtype).itemsize
                        + Ex_p.size * bpe
                        + ey_reads * Vyp * Kp * bpe
                        + B * NVX * 8 * 128 * 4),
    )

    kernel = functools.partial(
        _align_kernel, tvy=TVy, vx=Vx, vy=Vy,
        ey_resident=ey_resident, mask_vx=mask_vx, mask_vy=mask_vy)

    ey_spec = (pl.BlockSpec((1, Vyp, Kp), lambda b, i, j: (b, 0, 0))
               if ey_resident else
               pl.BlockSpec((1, TVy, Kp), lambda b, i, j: (b, j, 0)))

    partial_sums = pl.pallas_call(
        kernel,
        out_shape=jax.ShapeDtypeStruct((B, NVX, 8, 128), jnp.float32),
        grid_spec=pltpu.PrefetchScalarGridSpec(
            num_scalar_prefetch=0,
            grid=(B, NVX, NVY),
            in_specs=[
                pl.BlockSpec((1, Kp, Kp), lambda b, i, j: (b, 0, 0)),
                pl.BlockSpec((1, TVx, TVy), lambda b, i, j: (b, i, j)),
                pl.BlockSpec((1, TVx, Kp), lambda b, i, j: (b, i, 0)),
                ey_spec,
            ],
            out_specs=pl.BlockSpec((1, 1, 8, 128),
                                   lambda b, i, j: (b, i, 0, 0)),
            scratch_shapes=[
                pltpu.VMEM((TVx, Kp), jnp.float32),  # A = Ex @ Cyx (hoisted)
                pltpu.VMEM((TVx, Kp), jnp.float32),  # accumulator for P @ Ey
            ],
        ),
        compiler_params=pltpu.CompilerParams(
            dimension_semantics=("parallel", "parallel", "arbitrary"),
            vmem_limit_bytes=vmem_bytes,
        ),
        cost_estimate=cost,
    )(Cyx_p, Pxy, Ex_p, Ey_p)

    # FrobeniusLoss: per-batch sum of the vx-tile partials, then mean over B.
    per_batch = jnp.sum(partial_sums[:, :, 0, 0], axis=1)
    return loss_weight * jnp.mean(per_batch)


def _reference(Cyx, Pxy, evecs_x, evecs_y, loss_weight=1.0):
    a = jnp.einsum('bvk,bkl->bvl', evecs_x, Cyx)
    b = jnp.einsum('bvw,bwk->bvk', Pxy, evecs_y)
    return loss_weight * jnp.mean(jnp.sum((a - b) ** 2, axis=(1, 2)))


if __name__ == "__main__":
    key = jax.random.PRNGKey(0)

    # --- Test 1: small, aligned shapes (single tile per (b, i)). ----------
    B, K, Vx, Vy = 2, 32, 64, 64
    loss_weight = 1.0
    k1, k2, k3, k4, k5, k6, k7, k8 = jax.random.split(key, 8)
    Cyx = jax.random.normal(k1, (B, K, K), dtype=jnp.float32)
    Pxy = jax.random.normal(k2, (B, Vx, Vy), dtype=jnp.float32)
    evecs_x = jax.random.normal(k3, (B, Vx, K), dtype=jnp.float32)
    evecs_y = jax.random.normal(k4, (B, Vy, K), dtype=jnp.float32)

    ref = jax.block_until_ready(_reference(Cyx, Pxy, evecs_x, evecs_y,
                                           loss_weight))
    out = jax.block_until_ready(align_loss(Cyx, Pxy, evecs_x, evecs_y,
                                           loss_weight))
    assert jnp.allclose(out, ref, rtol=1e-4, atol=1e-3), (out, ref)

    # --- Test 2: ragged Vx / Vy edges + multi-tile grid (in-kernel masks). -
    B2_, K2_, Vx2, Vy2 = 2, 20, 72, 200
    Cyx2 = jax.random.normal(k5, (B2_, K2_, K2_), dtype=jnp.float32)
    Pxy2 = jax.random.normal(k6, (B2_, Vx2, Vy2), dtype=jnp.float32)
    ex2 = jax.random.normal(k7, (B2_, Vx2, K2_), dtype=jnp.float32)
    ey2 = jax.random.normal(k8, (B2_, Vy2, K2_), dtype=jnp.float32)

    ref2 = jax.block_until_ready(_reference(Cyx2, Pxy2, ex2, ey2, 0.5))
    # Resident-Ey path, small tiles to force NVX>1, NVY>1 and edge masking.
    out2 = jax.block_until_ready(
        align_loss(Cyx2, Pxy2, ex2, ey2, 0.5, tvx=16, tvy=128))
    assert jnp.allclose(out2, ref2, rtol=1e-4, atol=1e-2), (out2, ref2)
    # Tiled-Ey fallback path (residency budget forced to 0).
    out3 = jax.block_until_ready(
        align_loss(Cyx2, Pxy2, ex2, ey2, 0.5, tvx=16, tvy=128,
                   ey_resident_max_bytes=0))
    assert jnp.allclose(out3, ref2, rtol=1e-4, atol=1e-2), (out3, ref2)

    print("KERNEL_OK")
</pallas_src>

<mosaic_0001>
module attributes {stable_mosaic.version = 11 : i64} {
  func.func @_align_kernel(%arg0: i32, %arg1: i32, %arg2: i32, %arg3: memref<1x128x128xf32, #tpu.memory_space<vmem>>, %arg4: memref<1x64x64xf32, #tpu.memory_space<vmem>>, %arg5: memref<1x64x128xf32, #tpu.memory_space<vmem>>, %arg6: memref<1x64x128xf32, #tpu.memory_space<vmem>>, %arg7: memref<1x1x8x128xf32, #tpu.memory_space<vmem>>, %arg8: memref<64x128xf32, #tpu.memory_space<vmem>>, %arg9: memref<64x128xf32, #tpu.memory_space<vmem>>) attributes {dimension_semantics = [#tpu.dimension_semantics<parallel>, #tpu.dimension_semantics<parallel>, #tpu.dimension_semantics<arbitrary>], iteration_bounds = array<i64: 2, 1, 1>, scalar_prefetch = 0 : i64, scratch_operands = 2 : i64, tpu.core_type = #tpu.core_type<tc>, window_params = [{transform_indices = @transform_0, window_bounds = array<i64: 1, 128, 128>}, {transform_indices = @transform_1, window_bounds = array<i64: 1, 64, 64>}, {transform_indices = @transform_2, window_bounds = array<i64: 1, 64, 128>}, {transform_indices = @transform_3, window_bounds = array<i64: 1, 64, 128>}, {transform_indices = @transform_4, window_bounds = array<i64: 1, 1, 8, 128>}]} {
    %c0_i32 = arith.constant 0 : i32
    %0 = arith.cmpi eq, %arg2, %c0_i32 : i32
    %1 = arith.extui %0 : i1 to i32
    %c0_i32_0 = arith.constant 0 : i32
    %2 = arith.cmpi ne, %1, %c0_i32_0 : i32
    scf.if %2 {
      %c0_11 = arith.constant 0 : index
      %c0_12 = arith.constant 0 : index
      %c0_13 = arith.constant 0 : index
      %17 = vector.load %arg5[%c0_11, %c0_12, %c0_13] : memref<1x64x128xf32, #tpu.memory_space<vmem>>, vector<1x64x128xf32>
      %18 = vector.shape_cast %17 : vector<1x64x128xf32> to vector<64x128xf32>
      %c0_14 = arith.constant 0 : index
      %c0_15 = arith.constant 0 : index
      %c0_16 = arith.constant 0 : index
      %19 = vector.load %arg3[%c0_14, %c0_15, %c0_16] : memref<1x128x128xf32, #tpu.memory_space<vmem>>, vector<1x128x128xf32>
      %20 = vector.shape_cast %19 : vector<1x128x128xf32> to vector<128x128xf32>
      %cst_17 = arith.constant dense<0.000000e+00> : vector<64x128xf32>
      %21 = tpu.matmul %18, %20, %cst_17 {dimension_numbers = #tpu.dot_dimension_numbers<[1], [0], [0], [1], [0, 0, 1, 1], [], []>} : vector<64x128xf32>, vector<128x128xf32>, vector<64x128xf32> -> vector<64x128xf32>
      %c0_18 = arith.constant 0 : index
      %c0_19 = arith.constant 0 : index
      %22 = vector.load %arg8[%c0_18, %c0_19] : memref<64x128xf32, #tpu.memory_space<vmem>>, vector<64x128xf32>
      tpu.vector_store %arg8[%c0_18, %c0_19], %21 {strides = array<i32>} : memref<64x128xf32, #tpu.memory_space<vmem>>, vector<64x128xf32>,
      %cst_20 = arith.constant 0.000000e+00 : f32
      %23 = vector.broadcast %cst_20 : f32 to vector<64x128xf32>
      %c0_21 = arith.constant 0 : index
      %c0_22 = arith.constant 0 : index
      %24 = vector.load %arg9[%c0_21, %c0_22] : memref<64x128xf32, #tpu.memory_space<vmem>>, vector<64x128xf32>
      tpu.vector_store %arg9[%c0_21, %c0_22], %23 {strides = array<i32>} : memref<64x128xf32, #tpu.memory_space<vmem>>, vector<64x128xf32>,
    } else {
    }
    %c0 = arith.constant 0 : index
    %c0_1 = arith.constant 0 : index
    %c0_2 = arith.constant 0 : index
    %3 = vector.load %arg4[%c0, %c0_1, %c0_2] : memref<1x64x64xf32, #tpu.memory_space<vmem>>, vector<1x64x64xf32>
    %4 = vector.shape_cast %3 : vector<1x64x64xf32> to vector<64x64xf32>
    %c64_i32 = arith.constant 64 : i32
    %5 = arith.muli %arg2, %c64_i32 : i32
    %6 = tpu.assume_multiple %5, 64 : i32
    %c0_3 = arith.constant 0 : index
    %7 = arith.index_cast %6 : i32 to index
    %c0_4 = arith.constant 0 : index
    %8 = vector.load %arg6[%c0_3, %7, %c0_4] : memref<1x64x128xf32, #tpu.memory_space<vmem>>, vector<1x64x128xf32>
    %9 = vector.shape_cast %8 : vector<1x64x128xf32> to vector<64x128xf32>
    %c0_5 = arith.constant 0 : index
    %c0_6 = arith.constant 0 : index
    %10 = vector.load %arg9[%c0_5, %c0_6] : memref<64x128xf32, #tpu.memory_space<vmem>>, vector<64x128xf32>
    %cst = arith.constant dense<0.000000e+00> : vector<64x128xf32>
    %11 = tpu.matmul %4, %9, %cst {dimension_numbers = #tpu.dot_dimension_numbers<[1], [0], [0], [1], [0, 0, 1, 1], [], []>} : vector<64x64xf32>, vector<64x128xf32>, vector<64x128xf32> -> vector<64x128xf32>
    %12 = arith.addf %10, %11 : vector<64x128xf32>
    %c0_7 = arith.constant 0 : index
    %c0_8 = arith.constant 0 : index
    %13 = vector.load %arg9[%c0_7, %c0_8] : memref<64x128xf32, #tpu.memory_space<vmem>>, vector<64x128xf32>
    tpu.vector_store %arg9[%c0_7, %c0_8], %12 {strides = array<i32>} : memref<64x128xf32, #tpu.memory_space<vmem>>, vector<64x128xf32>,
    %c0_i32_9 = arith.constant 0 : i32
    %14 = arith.cmpi eq, %arg2, %c0_i32_9 : i32
    %15 = arith.extui %14 : i1 to i32
    %c0_i32_10 = arith.constant 0 : i32
    %16 = arith.cmpi ne, %15, %c0_i32_10 : i32
    scf.if %16 {
      %c0_11 = arith.constant 0 : index
      %c0_12 = arith.constant 0 : index
      %17 = vector.load %arg8[%c0_11, %c0_12] : memref<64x128xf32, #tpu.memory_space<vmem>>, vector<64x128xf32>
      %c0_13 = arith.constant 0 : index
      %c0_14 = arith.constant 0 : index
      %18 = vector.load %arg9[%c0_13, %c0_14] : memref<64x128xf32, #tpu.memory_space<vmem>>, vector<64x128xf32>
      %19 = arith.subf %17, %18 : vector<64x128xf32>
      %20 = arith.mulf %19, %19 : vector<64x128xf32>
      %21 = vector.shape_cast %20 : vector<64x128xf32> to vector<1x64x128xf32>
      %cst_15 = arith.constant dense<0.000000e+00> : vector<1xf32>
      %22 = vector.multi_reduction <add>, %21, %cst_15 [1, 2] : vector<1x64x128xf32> to vector<1xf32>
      %23 = vector.shape_cast %22 : vector<1xf32> to vector<1x1x1xf32>
      %24 = vector.extract %23[0, 0, 0] : f32 from vector<1x1x1xf32>
      %25 = vector.broadcast %24 : f32 to vector<8x128xf32>
      %c0_16 = arith.constant 0 : index
      %c0_17 = arith.constant 0 : index
      %c0_18 = arith.constant 0 : index
      %c0_19 = arith.constant 0 : index
      %26 = vector.load %arg7[%c0_16, %c0_17, %c0_18, %c0_19] : memref<1x1x8x128xf32, #tpu.memory_space<vmem>>, vector<1x1x8x128xf32>
      %27 = vector.shape_cast %26 : vector<1x1x8x128xf32> to vector<8x128xf32>
      %28 = vector.shape_cast %25 : vector<8x128xf32> to vector<1x1x8x128xf32>
      tpu.vector_store %arg7[%c0_16, %c0_17, %c0_18, %c0_19], %28 {strides = array<i32>} : memref<1x1x8x128xf32, #tpu.memory_space<vmem>>, vector<1x1x8x128xf32>,
    } else {
    }
    return
  }
  func.func @transform_0(%arg0: i32, %arg1: i32, %arg2: i32) -> (i32, i32, i32) {
    %c0_i32 = arith.constant 0 : i32
    %c0_i32_0 = arith.constant 0 : i32
    %c0_i32_1 = arith.constant 0 : i32
    return %arg0, %c0_i32, %c0_i32_0 : i32, i32, i32
  }
  func.func @transform_1(%arg0: i32, %arg1: i32, %arg2: i32) -> (i32, i32, i32) {
    %c0_i32 = arith.constant 0 : i32
    return %arg0, %arg1, %arg2 : i32, i32, i32
  }
  func.func @transform_2(%arg0: i32, %arg1: i32, %arg2: i32) -> (i32, i32, i32) {
    %c0_i32 = arith.constant 0 : i32
    %c0_i32_0 = arith.constant 0 : i32
    return %arg0, %arg1, %c0_i32 : i32, i32, i32
  }
  func.func @transform_3(%arg0: i32, %arg1: i32, %arg2: i32) -> (i32, i32, i32) {
    %c0_i32 = arith.constant 0 : i32
    %c0_i32_0 = arith.constant 0 : i32
    %c0_i32_1 = arith.constant 0 : i32
    return %arg0, %c0_i32, %c0_i32_0 : i32, i32, i32
  }
  func.func @transform_4(%arg0: i32, %arg1: i32, %arg2: i32) -> (i32, i32, i32, i32) {
    %c0_i32 = arith.constant 0 : i32
    %c0_i32_0 = arith.constant 0 : i32
    %c0_i32_1 = arith.constant 0 : i32
    return %arg0, %arg1, %c0_i32, %c0_i32_0 : i32, i32, i32, i32
  }
}

</mosaic_0001>

<bundles_post_ra>
// kernel: tpu_custom_call.1
= control target key start
LH: loop header
LB: loop body
LE: loop exit
PB: predicated region body
PF: predicated region fallthrough
CT: control target
= control target key end

     0   :  { %s1426_s0 = inlined_call_operand.hbm [shape: f32[2,128,128], index: 0, kind: input, shape index: {}]   ;;  %s1427_s1 = inlined_call_operand.hbm [shape: f32[2,64,64], index: 1, kind: input, shape index: {}]   ;;  %s1428_s2 = inlined_call_operand.hbm [shape: f32[2,64,128], index: 2, kind: input, shape index: {}]   ;;  %s1429_s3 = inlined_call_operand.hbm [shape: f32[2,64,128], index: 3, kind: input, shape index: {}]   ;;  %s1430_s4 = inlined_call_operand.hbm [shape: f32[2,1,8,128], index: 4, kind: output, shape index: {}]  }
   0x1   :  { %1436 = sst [smem:[#allocation22_spill]] %s1426_s0 }
   0x2   :  { %1437 = sst [smem:[#allocation23_spill]] %s1427_s1 }
   0x3   :  { %9 = vsyncpa [#allocation5], 0 }
   0x4   :  { %11 = vsyncpa [#allocation5 + $0x1], 0 }
   0x5   :  { %12 = vsyncpa [#allocation8], 0 }
   0x6   :  { %14 = vsyncpa [#allocation8 + $0x1], 0 }
   0x7   :  { %15 = vsyncpa [#allocation11], 0 }
   0x8   :  { %17 = vsyncpa [#allocation11 + $0x1], 0 }
   0x9   :  { %18 = vsyncpa [#allocation6], 0 }
   0xa   :  { %20 = vsyncpa [#allocation6 + $0x1], 0  ;;  %s1177_s15 = smov 0   ;;  %s1179_s16 = smov 0  }
   0xb   :  { %s1181_s17 = smov 0   ;;  %s1183_s18 = smov 0  }
   0xc   :  { %s1185_s19 = smov 0   ;;  %s1187_s20 = smov 0  }
   0xd LB: > { %1438 = sst [smem:[#allocation17_spill]] %s1136_s17  ;;  %s1208_s21 = sadd.s32 4294967295, %s1148_s20   ;;  %s1148_s20 = sphi %s1187_s20, %s26_s20   ;;  %s1144_s19 = sphi %s1185_s19, %s1455_s19   ;;  %s1140_s18 = sphi %s1183_s18, %s1454_s18   ;;  %s1136_s17 = sphi %s1181_s17, %s1453_s17   ;;  %s1132_s16 = sphi %s1179_s16, %s1457_s16   ;;  %s1128_s15 = sphi %s1177_s15, %s1456_s15  }
   0xe   : > { %1439 = sst [smem:[#allocation18_spill]] %s1144_s19  ;;  %s796_s22 = sadd.s32 4294967294, %s1148_s20  }
   0xf   : > { %1440 = sst [smem:[#allocation19_spill]] %s1148_s20  ;;  %s45_s23 = sadd.s32 1, %s1144_s19 }
  0x10   : > { %s52_s24 = sadd.s32 1, %s1136_s17  ;;  %p47_p0 = scmp.ge.s32.totalorder %s45_s23, 2 }
  0x11   : > { %p59_p1 = scmp.ne.s32.totalorder %s1136_s17, %s1132_s16  ;;  %p60_p2 = scmp.eq.s32.totalorder %s1148_s20, 0 }
  0x12   : > { %p65_p3 = scmp.ne.s32.totalorder %s1132_s16, %s1128_s15  ;;  %s1459_s23 = smov (%p47_p0, %s45_s23), 0 }
  0x13   : > { %1441 = sst [smem:[#allocation20_spill]] %s1459_s23  ;;  %p1220_p4 = por %p60_p2, %p59_p1 }
  0x14   : > { %p66_p5 = scmp.eq.s32.totalorder %s1208_s21, 0  ;;  %s49_s26 = ssub.s32 %s1144_s19, %s1459_s23 }
  0x15   : > { %p175_p6 = scmp.eq.s32.totalorder %s1208_s21, 1  ;;  %p50_p7 = scmp.eq.s32.totalorder %s49_s26, 0 }
  0x16   : > { %p1228_p8 = por %p66_p5, %p65_p3  ;;  %p181_p10 = scmp.eq.s32.totalorder %s796_s22, 1 }
  0x17   : > { %p1232_p9 = por %p175_p6, %p59_p1  ;;  %p798_p12 = scmp.ge.s32.totalorder %s1148_s20, 2 }
  0x18   : > { %s1237_s29 = scalar_select %p50_p7, %s1136_s17, %s52_s24  }
  0x19   : > { %p1239_p11 = por %p181_p10, %p65_p3  ;;  %p886_p13 = scmp.lt.s32.totalorder %s1148_s20, 2 }
  0x1a   : > { %1445 = sst [smem:[#allocation21_spill]] %s1237_s29  ;;  %s1246_s5 = sand.u32 1, %s1136_s17  }
  0x1b   : > { %p1250_p0 = pnand %p886_p13, %p1220_p4  ;;  %s223_s7 = sand.u32 1, %s1148_s20  }
  0x1c   : > { %s1256_s8 = sshll.u32 %s1246_s5, 6  ;;  %s1259_s9 = sshll.u32 %s1144_s19, 6 }
  0x1d   : > { %s227_s10 = scalar_lea.vmem [#allocation7], %s1256_s8  ;;  %s1448_s1 = sld [smem:[#allocation23_spill]] }
  0x1e   : > { %s238_s11 = sshll.u32 %s227_s10, 4  ;;  %p811_p1 = scmp.ge.s32.totalorder %s1148_s20, 1  ;;  %s239_s11 = int_to_ptr.vmem [resolvable:$true] %s238_s11 }
  0x1f   : > { %p292_p2 = scmp.lt.s32.totalorder %s1148_s20, 3  ;;  %s224_s24 = scalar_lea.sflag [#allocation8], %s223_s7 }
  0x20   : > { %s1150_s25 = smov 128   ;;  %s1151_s26 = smov 8  }
  0x21   : > { %p1273_p3 = pnand %p811_p1, %p292_p2  ;;  %s799_s12 = sshll.u32 %s1246_s5, 7 }
  0x22   : > { %s829_s13 = sshll.u32 %s1144_s19, 7  ;;  %s1450_s0 = sld [smem:[#allocation22_spill]] }
  0x23   : > { %s235_s14 = scalar_lea.hbm %s1448_s1, %s1259_s9  ;;  %s205_s29 = scalar_lea.vmem [#allocation4], %s799_s12 }
  0x24   : > { %s236_s22 = sshll.u32 %s235_s14, 4  ;;  %s213_s17 = sshll.u32 %s205_s29, 4  ;;  %s237_s22 = int_to_ptr.hbm [resolvable:$true] %s236_s22  ;;  %s214_s17 = int_to_ptr.vmem [resolvable:$true] %s213_s17 }
  0x25   : > { %875 = dma.hbm_to_vmem [thread:$0]  (!%p1250_p0), %s237_s22, 1024, %s239_s11, %s224_s24, %s1150_s25, %s1150_s25, %s1151_s26  }
  0x26   : > { %s202_s11 = scalar_lea.sflag [#allocation5], %s1246_s5  ;;  %s259_s1 = scalar_lea.hbm %s1428_s2, %s1259_s9 }
  0x27   : > { %s260_s14 = sshll.u32 %s259_s1, 4  ;;  %s276_s20 = scalar_lea.vmem [#allocation10], %s1256_s8  ;;  %s261_s14 = int_to_ptr.hbm [resolvable:$true] %s260_s14 }
  0x28   : > { %s210_s7 = scalar_lea.hbm %s1450_s0, %s829_s13  ;;  %s252_s13 = scalar_lea.vmem [#allocation9], %s1256_s8 }
  0x29   : > { %s211_s23 = sshll.u32 %s210_s7, 4  ;;  %s262_s0 = sshll.u32 %s252_s13, 4  ;;  %s212_s23 = int_to_ptr.hbm [resolvable:$true] %s211_s23  ;;  %s263_s0 = int_to_ptr.vmem [resolvable:$true] %s262_s0 }
  0x2a   : > { %872 = dma.hbm_to_vmem [thread:$0]  (!%p1250_p0), %s212_s23, 2048, %s214_s17, %s202_s11, %s1150_s25, %s1150_s25, %s1151_s26  }
  0x2b   : > { %878 = dma.hbm_to_vmem [thread:$0]  (!%p1250_p0), %s261_s14, 1024, %s263_s0, %s224_s24, %s1150_s25, %s1150_s25, %s1151_s26  }
  0x2c   : > { %s281_s7 = scalar_lea.hbm %s1429_s3, %s1259_s9  ;;  %s284_s17 = sshll.u32 %s276_s20, 4  ;;  %s285_s17 = int_to_ptr.vmem [resolvable:$true] %s284_s17 }
  0x2d   : > { %s282_s23 = sshll.u32 %s281_s7, 4  ;;  %s273_s19 = scalar_lea.sflag [#allocation11], %s1246_s5  ;;  %s283_s23 = int_to_ptr.hbm [resolvable:$true] %s282_s23 }
  0x2e   : > { %881 = dma.hbm_to_vmem [thread:$0]  (!%p1250_p0), %s283_s23, 1024, %s285_s17, %s273_s19, %s1150_s25, %s1150_s25, %s1151_s26  }
  0x2f   : > { %296 = sbr.rel (%p1273_p3) target bundleno = 444 (0x1bc), region = 36  ;;  %s1312_s0 = sand.u32 (!%p1273_p3), 1, %s1132_s16  }
  0x30   : > { %s812_s8 = sshll.u32 (!%p1273_p3), %s1312_s0, 7  ;;  %s299_s20 = scalar_lea.sflag (!%p1273_p3), [#allocation5], %s1312_s0 }
  0x31   : > { %s1316_s9 = scalar_lea.vmem (!%p1273_p3), [#allocation4], %s812_s8 }
  0x34   : > { %1111 = dma.done.wait (%p1228_p8), %s299_s20, 2048  }
  0x35   : > { %1113 = vsyncadd (%p1228_p8), %s299_s20, 4294965248  ;;  %s308_s5 = sand.u32 1, %s1208_s21   ;;  %s813_s6 = sshll.u32 %s1312_s0, 6 }
  0x36   : > { %s309_s24 = scalar_lea.sflag [#allocation8], %s308_s5  ;;  %s1324_s25 = scalar_lea.vmem [#allocation7], %s813_s6 }
  0x37   : > { %1115 = dma.done.wait (%p1228_p8), %s309_s24, 2048  }
  0x38   : > { %1117 = vsyncadd (%p1228_p8), %s309_s24, 4294965248  ;;  %s1330_s26 = scalar_lea.vmem [#allocation9], %s813_s6  ;;  %s329_s10 = scalar_lea.sflag [#allocation11], %s1312_s0 }
  0x39   : > { %s1333_s11 = scalar_lea.vmem [#allocation10], %s813_s6 }
  0x3a   : > { %1119 = dma.done.wait (%p1228_p8), %s329_s10, 1024  }
  0x3b   : > { %1121 = vsyncadd (%p1228_p8), %s329_s10, 4294966272  ;;  %v402_v0 = vld [vmem:[%s1316_s9 + $0x78] sm:$0xff]  ;;  %v401_v2 = vld [vmem:[%s1316_s9 + $0x70] sm:$0xff]  ;;  %vm486_vm0 = vcmask 523264   ;;  %s816_s21 = sshll.u32 %s1312_s0, 3  ;;  %s826_s27 = sshll.u32 %s1140_s18, 3 }
  0x3c   : > { %v477_v1 = vld [vmem:[%s1333_s11 + $0x38] sm:$0xff]  ;;  %403 = vmatpush.msra.mxu0 %v402_v0  ;;  %833 = vmatpush.msra.mxu2 %v402_v0  ;;  %v476_v3 = vld [vmem:[%s1333_s11 + $0x30] sm:$0xff]  ;;  %v400_v4 = vld [vmem:[%s1316_s9 + $0x68] sm:$0xff]  ;;  %s633_s14 = scalar_lea.hbm %s1430_s4, %s826_s27  ;;  %s372_s13 = scalar_lea.vmem [#allocation12], %s816_s21 }
  0x3d   : > { %519 = vmatpush.msra.mxu1 %v477_v1  ;;  %849 = vmatpush.msra.mxu3 %v477_v1  ;;  %v475_v5 = vld [vmem:[%s1333_s11 + $0x28] sm:$0xff]  ;;  %v399_v6 = vld [vmem:[%s1316_s9 + $0x60] sm:$0xff]  ;;  %v398_v8 = vld [vmem:[%s1316_s9 + $0x58] sm:$0xff]  ;;  %s635_s29 = sshll.u32 %s372_s13, 4  ;;  %s637_s12 = sshll.u32 %s633_s14, 4  ;;  %s636_s29 = int_to_ptr.vmem [resolvable:$true] %s635_s29  ;;  %s638_s12 = int_to_ptr.hbm [resolvable:$true] %s637_s12 }
  0x3e   : > { %404 = vmatpush.msra.mxu0 %v401_v2  ;;  %834 = vmatpush.msra.mxu2 %v401_v2  ;;  %v474_v7 = vld [vmem:[%s1333_s11 + $0x20] sm:$0xff]  ;;  %v473_v9 = vld [vmem:[%s1333_s11 + $0x18] sm:$0xff]  ;;  %v397_v10 = vld [vmem:[%s1316_s9 + $0x50] sm:$0xff]  ;;  %s622_s17 = scalar_lea.sflag [#allocation6], %s1312_s0  ;;  %s1072_s23 = sshra.s32 %s638_s12, 4  ;;  %s1073_s23 = int_to_ptr.hbm [resolvable:$true] %s1072_s23 }
  0x3f   : > { %520 = vmatpush.msra.mxu1 %v476_v3  ;;  %850 = vmatpush.msra.mxu3 %v476_v3  ;;  %v472_v11 = vld [vmem:[%s1333_s11 + $0x10] sm:$0xff]  ;;  %v396_v12 = vld [vmem:[%s1316_s9 + $0x48] sm:$0xff]  ;;  %v395_v14 = vld [vmem:[%s1316_s9 + $0x40] sm:$0xff]  ;;  %s1074_s19 = scalar_lea.hbm %s1073_s23, 8  ;;  %s1078_s20 = scalar_lea.hbm %s1430_s4, 16 }
  0x40   : > { %405 = vmatpush.msra.mxu0 %v400_v4  ;;  %835 = vmatpush.msra.mxu2 %v400_v4  ;;  %v471_v13 = vld [vmem:[%s1333_s11 + $0x8] sm:$0xff]  ;;  %v470_v15 = vld [vmem:[%s1333_s11] sm:$0xff]  ;;  %v394_v17 = vld [vmem:[%s1316_s9 + $0x38] sm:$0xff]  ;;  %p1075_p4 = scmp.ne.s32.totalorder %s1073_s23, %s1074_s19  ;;  %p1079_p7 = scmp.lt.s32.totalorder %s1073_s23, %s1430_s4 }
  0x41   : > { %521 = vmatpush.msra.mxu1 %v475_v5  ;;  %851 = vmatpush.msra.mxu3 %v475_v5  ;;  %v460_v16 = vld [vmem:[%s1324_s25] sm:$0xff]  ;;  %v393_v18 = vld [vmem:[%s1316_s9 + $0x30] sm:$0xff]  ;;  %v465_v19 = vld [vmem:[%s1324_s25 + $0x28] sm:$0xff]  ;;  %p1080_p8 = scmp.lt.s32.totalorder %s1078_s20, %s1074_s19 }
  0x42   : > { %406 = vmatpush.msra.mxu0 %v399_v6  ;;  %836 = vmatpush.msra.mxu2 %v399_v6  ;;  %v392_v20 = vld [vmem:[%s1316_s9 + $0x28] sm:$0xff]  ;;  %v391_v21 = vld [vmem:[%s1316_s9 + $0x20] sm:$0xff]  ;;  %v390_v23 = vld [vmem:[%s1316_s9 + $0x18] sm:$0xff]  ;;  %p1076_p5 = pnand %p1075_p4, %p1232_p9 }
  0x43   : > { %522 = vmatpush.msra.mxu1 %v474_v7  ;;  %852 = vmatpush.msra.mxu3 %v474_v7  ;;  %v461_v22 = vld [vmem:[%s1324_s25 + $0x8] sm:$0xff]  ;;  %v389_v24 = vld [vmem:[%s1316_s9 + $0x10] sm:$0xff]  ;;  %v387_v27 = vld [vmem:[%s1316_s9] sm:$0xff]  ;;  %p1081_p10 = por %p1080_p8, %p1079_p7 }
  0x44   : > { %407 = vmatpush.msra.mxu0 %v398_v8  ;;  %837 = vmatpush.msra.mxu2 %v398_v8  ;;  %v466_v25 = vld [vmem:[%s1324_s25 + $0x30] sm:$0xff]  ;;  %v388_v26 = vld [vmem:[%s1316_s9 + $0x8] sm:$0xff]  ;;  %v379_v28 = vld [vmem:[%s1330_s26] sm:$0xff]  ;;  %p1077_p6 = pneg %p1076_p5 }
  0x45   : > { %523 = vmatpush.msra.mxu1 %v473_v9  ;;  %853 = vmatpush.msra.mxu3 %v473_v9  ;;  %v382_v29 = vld [vmem:[%s1330_s26 + $0x18] sm:$0xff]  ;;  %v462_v30 = vld [vmem:[%s1324_s25 + $0x10] sm:$0xff]  ;;  %v380_v32 = vld [vmem:[%s1330_s26 + $0x8] sm:$0xff] }
  0x46   : > { %408 = vmatpush.msra.mxu0 %v397_v10  ;;  %838 = vmatpush.msra.mxu2 %v397_v10  ;;  %v467_v31 = vld [vmem:[%s1324_s25 + $0x38] sm:$0xff]  ;;  %v383_v33 = vld [vmem:[%s1330_s26 + $0x20] sm:$0xff]  ;;  %v381_v35 = vld [vmem:[%s1330_s26 + $0x10] sm:$0xff]  ;;  %p1082_p13 = pnand %p1081_p10, %p1077_p6 }
  0x47   : > { %524 = vmatpush.msra.mxu1 %v472_v11  ;;  %854 = vmatpush.msra.mxu3 %v472_v11  ;;  %v463_v34 = vld [vmem:[%s1324_s25 + $0x18] sm:$0xff]  ;;  %v384_v36 = vld [vmem:[%s1330_s26 + $0x28] sm:$0xff]  ;;  %v464_v37 = vld [vmem:[%s1324_s25 + $0x20] sm:$0xff] }
  0x48   : > { %409 = vmatpush.msra.mxu0 %v396_v12  ;;  %839 = vmatpush.msra.mxu2 %v396_v12  ;;  %v385_v38 = vld [vmem:[%s1330_s26 + $0x30] sm:$0xff]  ;;  %v386_v39 = vld [vmem:[%s1330_s26 + $0x38] sm:$0xff] }
  0x49   : > { %525 = vmatpush.msra.mxu1 %v471_v13  ;;  %855 = vmatpush.msra.mxu3 %v471_v13 }
  0x4a   : > { %410 = vmatpush.msra.mxu0 %v395_v14  ;;  %840 = vmatpush.msra.mxu2 %v395_v14 }
  0x4b   : > { %526 = vmatpush.msra.mxu1 %v470_v15  ;;  %856 = vmatpush.msra.mxu3 %v470_v15 }
  0x4c   : > { %817 = vmatmul.msk.f32.vlgmr.msra.gmra.mxu1 %vm486_vm0, %v460_v16  ;;  %411 = vmatpush.msra.mxu0 %v394_v17 }
  0x4d   : > { %841 = vmatpush.msra.mxu2 %v394_v17  ;;  %822 = vmatmul.msk.f32.vlgmr.msra.gmra.mxu3 %vm486_vm0, %v465_v19 }
  0x4e   : > { %412 = vmatpush.msra.mxu0 %v393_v18 }
  0x4f   : > { %842 = vmatpush.msra.mxu2 %v393_v18 }
  0x50   : > { %413 = vmatpush.msra.mxu0 %v392_v20 }
  0x51   : > { %843 = vmatpush.msra.mxu2 %v392_v20 }
  0x52   : > { %414 = vmatpush.msra.mxu0 %v391_v21 }
  0x53   : > { %844 = vmatpush.msra.mxu2 %v391_v21 }
  0x54   : > { %818 = vmatmul.msk.f32.gmra.mxu1 %vm486_vm0, %v461_v22  ;;  %415 = vmatpush.msra.mxu0 %v390_v23 }
  0x55   : > { %845 = vmatpush.msra.mxu2 %v390_v23  ;;  %823 = vmatmul.msk.f32.gmra.mxu3 %vm486_vm0, %v466_v25 }
  0x56   : > { %416 = vmatpush.msra.mxu0 %v389_v24 }
  0x57   : > { %846 = vmatpush.msra.mxu2 %v389_v24 }
  0x58   : > { %417 = vmatpush.msra.mxu0 %v388_v26 }
  0x59   : > { %847 = vmatpush.msra.mxu2 %v388_v26 }
  0x5a   : > { %418 = vmatpush.msra.mxu0 %v387_v27 }
  0x5b   : > { %848 = vmatpush.msra.mxu2 %v387_v27  ;;  %419 = vmatmul.f32.vlgmr.msra.gmra.mxu0 %v379_v28 }
  0x5c   : > { %428 = vmatmul.f32.vlgmr.msra.gmra.mxu2 %v382_v29  ;;  %819 = vmatmul.msk.f32.gmra.mxu1 %vm486_vm0, %v462_v30 }
  0x5d   : > { %824 = vmatmul.msk.f32.gmra.mxu3 %vm486_vm0, %v467_v31 }
  0x63   : > { %422 = vmatmul.f32.gmra.mxu0 %v380_v32 }
  0x64   : > { %431 = vmatmul.f32.gmra.mxu2 %v383_v33  ;;  %820 = vmatmul.msk.f32.gmra.mxu1 %vm486_vm0, %v463_v34 }
  0x6b   : > { %425 = vmatmul.f32.gmra.mxu0 %v381_v35 }
  0x6c   : > { %434 = vmatmul.f32.gmra.mxu2 %v384_v36  ;;  %821 = vmatmul.msk.f32.gmra.mxu1 %vm486_vm0, %v464_v37 }
  0x74   : > { %437 = vmatmul.f32.gmra.mxu2 %v385_v38 }
  0x7c   : > { %440 = vmatmul.f32.gmra.mxu2 %v386_v39 }
  0xc9   : > { %v528_v40 = vpop.f32.mrf.mxu1 }
  0xd0   : > { %v543_v47 = vpop.f32.mrf.mxu3 }
  0xd1   : > { %v531_v41 = vpop.f32.mrf.mxu1 }
  0xd8   : > { %v420_v42 = vpop.f32.mrf.mxu0  ;;  %v546_v60 = vpop.f32.mrf.mxu3 }
  0xd9   : > { %v534_v43 = vpop.f32.mrf.mxu1  ;;  %v587_v51 = vsub.f32 %v420_v42, %v528_v40 }
  0xdb   : > { %v595_v55 = vmul.f32 %v587_v51, %v587_v51 }
  0xdf   : > { %v429_v44 = vpop.f32.mrf.mxu2 }
  0xe0   : > { %v423_v45 = vpop.f32.mrf.mxu0  ;;  %v549_v7 = vpop.f32.mrf.mxu3 }
  0xe1   : > { %v537_v48 = vpop.f32.mrf.mxu1  ;;  %v588_v50 = vsub.f32 %v423_v45, %v531_v41 }
  0xe2   : > { %v590_v58 = vsub.f32 %v429_v44, %v537_v48 }
  0xe3   : > { %v596_v53 = vmul.f32 %v588_v50, %v588_v50 }
  0xe4   : > { %v598_v62 = vmul.f32 %v590_v58, %v590_v58 }
  0xe5   : > { %v603_v57 = vadd.f32 %v596_v53, %v595_v55 }
  0xe7   : > { %v432_v46 = vpop.f32.mrf.mxu2 }
  0xe8   : > { %v426_v49 = vpop.f32.mrf.mxu0 }
  0xe9   : > { %v589_v52 = vsub.f32 %v426_v49, %v534_v43  ;;  %v540_v59 = vpop.f32.mrf.mxu1 }
  0xea   : > { %v591_v63 = vsub.f32 %v432_v46, %v540_v59 }
  0xeb   : > { %v597_v56 = vmul.f32 %v589_v52, %v589_v52 }
  0xec   : > { %v599_v3 = vmul.f32 %v591_v63, %v591_v63 }
  0xed   : > { %v604_v61 = vadd.f32 %v603_v57, %v597_v56 }
  0xef   : > { %v435_v54 = vpop.f32.mrf.mxu2  ;;  %v605_v1 = vadd.f32 %v604_v61, %v598_v62 }
  0xf0   : > { %v592_v2 = vsub.f32 %v435_v54, %v543_v47 }
  0xf1   : > { %v606_v5 = vadd.f32 %v605_v1, %v599_v3 }
  0xf2   : > { %v600_v6 = vmul.f32 %v592_v2, %v592_v2 }
  0xf4   : > { %v607_v10 = vadd.f32 %v606_v5, %v600_v6 }
  0xf7   : > { %v438_v0 = vpop.f32.mrf.mxu2 }
  0xf8   : > { %v593_v4 = vsub.f32 %v438_v0, %v546_v60 }
  0xfa   : > { %v601_v8 = vmul.f32 %v593_v4, %v593_v4 }
  0xfc   : > { %v608_v13 = vadd.f32 %v607_v10, %v601_v8 }
  0xff   : > { %v441_v9 = vpop.f32.mrf.mxu2 }
 0x100   : > { %v594_v11 = vsub.f32 %v441_v9, %v549_v7 }
 0x102   : > { %v602_v12 = vmul.f32 %v594_v11, %v594_v11 }
 0x104   : > { %v609_v14 = vadd.f32 %v608_v13, %v602_v12 }
 0x106   : > { %610 = vadd.xlane.f32.xlu0 %v609_v14 }
 0x179   : > { %v611_v15 = vpop.xlane.xlu0 %610 }
 0x17a   : > { %v612_v16 = vrot.slane %v611_v15, 4 }
 0x17c   : > { %v613_v17 = vadd.f32 %v612_v16, %v611_v15 }
 0x17e   : > { %v614_v18 = vrot.slane %v613_v17, 2 }
 0x180   : > { %v615_v19 = vadd.f32 %v614_v18, %v613_v17 }
 0x182   : > { %v616_v20 = vrot.slane %v615_v19, 1 }
 0x184   : > { %v617_v21 = vadd.f32 %v616_v20, %v615_v19 }
 0x186   : > { %857 = vpush %v617_v21 }
 0x1b7   : > { %s858_s7 = spop %857 }
 0x1b8   : > { %v619_v22 = vstv %s858_s7 }
 0x1b9   : > { %620 = vst [vmem:[%s372_s13] sm:$0xff] %v619_v22 }
 0x1ba   : > { %1085 = shalt.err (!%p1082_p13)
}
 0x1bb   : > { %867 = dma.vmem_to_hbm [thread:$0]  (%p1232_p9), %s636_s29, 128, %s638_s12, %s622_s17  }
 0x1bc PF: > { %s1451_s0 = sld [smem:[#allocation19_spill]]  ;;  %s649_s6 = sand.u32 1, %s1128_s15  }
 0x1bd   : > { %p883_p0 = pnand %p798_p12, %p1239_p11  ;;  %s650_s24 = scalar_lea.sflag [#allocation6], %s649_s6 }
 0x1bf   : > { %p884_p1 = pneg %p883_p0 }
 0x1c1   : > { %1123 = dma.done.wait (%p884_p1), %s650_s24, 128  }
 0x1c2   : > { %1125 = vsyncadd (%p884_p1), %s650_s24, 4294967168  ;;  %s26_s20 = sadd.s32 1, %s1451_s0   ;;  %s1452_s25 = sld [smem:[#allocation17_spill]] }
 0x1c3   : > { %p23_p2 = scmp.ge.s32.totalorder %s26_s20, 4   ;;  %s1453_s17 = sld [smem:[#allocation21_spill]] }
 0x1c4   : > { %s1454_s18 = sld [smem:[#allocation18_spill]]  ;;  %s1456_s15 = smov %s1132_s16 }
 0x1c5   : > { %s1455_s19 = sld [smem:[#allocation20_spill]]  ;;  %25 = sbr.rel (!%p23_p2) target bundleno = 13 (0xd), region = 127 }
 0x1c8   : > { %s1457_s16 = smov %s1452_s25 }
 0x1ca   :  { %656 = vsyncpa [#allocation5], 1 }
 0x1cb   :  { %658 = vsyncpa [#allocation5 + $0x1], 1 }
 0x1cc   :  { %659 = vsyncpa [#allocation8], 1 }
 0x1cd   :  { %661 = vsyncpa [#allocation8 + $0x1], 1 }
 0x1ce   :  { %662 = vsyncpa [#allocation11], 1 }
 0x1cf   :  { %664 = vsyncpa [#allocation11 + $0x1], 1 }
 0x1d0   :  { %665 = vsyncpa [#allocation6], 1 }
 0x1d1   :  { %667 = vsyncpa [#allocation6 + $0x1], 1 }

</bundles_post_ra>
